<compile_context>
chip_gen: v5e
topology: v5e:2x2
jax: 0.10.0
libtpu: 0.0.40
codegen_flags: <defaults>
</compile_context>

<pallas_src>
import jax
import jax.numpy as jnp
from jax.experimental import pallas as pl
from jax.experimental.pallas import tpu as pltpu

_MIN_MASS_VAL = 0.01  # constant from the PyTorch module


def _positive_mass_kernel(sqrt_mass_ref, out_ref):
    # Pure scalar-path work on sregs: one multiply + one add per element.
    n = sqrt_mass_ref.shape[0]  # static (tiny) trip count
    for i in range(n):
        s = sqrt_mass_ref[i]
        out_ref[i] = s * s + jnp.float32(_MIN_MASS_VAL)


def _positive_mass_fwd_kernel_call(sqrt_mass: jax.Array) -> jax.Array:
    n = sqrt_mass.shape[0]
    return pl.pallas_call(
        _positive_mass_kernel,
        out_shape=jax.ShapeDtypeStruct((n,), jnp.float32),
        in_specs=[pl.BlockSpec(memory_space=pltpu.MemorySpace.SMEM)],
        out_specs=pl.BlockSpec(memory_space=pltpu.MemorySpace.SMEM),
        cost_estimate=pl.CostEstimate(
            flops=2 * n, transcendentals=0, bytes_accessed=8 * n
        ),
    )(sqrt_mass)


@jax.custom_vjp
def positive_mass_value(sqrt_mass: jax.Array) -> jax.Array:
    """sqrt_mass: shape (N,) float32 (module uses N=1). Returns (N,) float32."""
    return _positive_mass_fwd_kernel_call(sqrt_mass)


def _positive_mass_value_fwd(sqrt_mass):
    return _positive_mass_fwd_kernel_call(sqrt_mass), sqrt_mass


def _positive_mass_value_bwd(sqrt_mass, g):
    # d/ds (s*s + c) = 2*s ; plain jnp — fused by XLA, no extra launch needed.
    return (2.0 * sqrt_mass * g,)


positive_mass_value.defvjp(_positive_mass_value_fwd, _positive_mass_value_bwd)


if __name__ == "__main__":
    key = jax.random.PRNGKey(0)
    # Mirror torch init: sqrt(rand(1) ** 2) == uniform sample in [0, 1).
    sqrt_mass = jnp.sqrt(jax.random.uniform(key, (1,), jnp.float32) ** 2)

    out = positive_mass_value(sqrt_mass)
    out = jax.block_until_ready(out)

    # Reference check in plain JAX.
    ref = sqrt_mass * sqrt_mass + jnp.float32(_MIN_MASS_VAL)
    assert out.shape == (1,)
    assert jnp.allclose(out, ref, rtol=1e-6, atol=1e-6), (out, ref)

    # Gradient check (the parameter must be trainable).
    grad = jax.grad(lambda s: positive_mass_value(s).sum())(sqrt_mass)
    grad = jax.block_until_ready(grad)
    assert jnp.allclose(grad, 2.0 * sqrt_mass, rtol=1e-6, atol=1e-6), (
        grad,
        2.0 * sqrt_mass,
    )

    print("KERNEL_OK")
</pallas_src>

<mosaic_0001>
module attributes {stable_mosaic.version = 11 : i64} {
  func.func @_positive_mass_kernel(%arg0: memref<1xf32, #tpu.memory_space<smem>>, %arg1: memref<1xf32, #tpu.memory_space<smem>>) attributes {dimension_semantics = [], scalar_prefetch = 0 : i64, scratch_operands = 0 : i64, tpu.core_type = #tpu.core_type<tc>} {
    %c0 = arith.constant 0 : index
    %0 = memref.load %arg0[%c0] : memref<1xf32, #tpu.memory_space<smem>>
    %1 = arith.mulf %0, %0 : f32
    %cst = arith.constant 0.00999999977 : f32
    %2 = arith.addf %1, %cst : f32
    %c0_0 = arith.constant 0 : index
    %3 = memref.load %arg1[%c0_0] : memref<1xf32, #tpu.memory_space<smem>>
    memref.store %2, %arg1[%c0_0] : memref<1xf32, #tpu.memory_space<smem>>
    return
  }
}

</mosaic_0001>

<bundles_post_ra>
// kernel: tpu_custom_call.1
= control target key start
LH: loop header
LB: loop body
LE: loop exit
PB: predicated region body
PF: predicated region fallthrough
CT: control target
= control target key end

     0   :  { %7 = vsyncpa [#allocation4], 0  ;;  %s45_s13 = smov [#allocation3]   ;;  %s63_s0 = inlined_call_operand.<no memory space> [shape: f32[1], index: 0, kind: input, shape index: {}]   ;;  %s64_s1 = inlined_call_operand.hbm [shape: f32[1], index: 1, kind: output, shape index: {}]  }
   0x1   :  { %s11_s8 = smul.f32 %s63_s0, %s63_s0  ;;  %s20_s11 = sshll.u32 %s64_s1, 4  ;;  %s21_s11 = int_to_ptr.hbm [resolvable:$true] %s20_s11 }
   0x3   :  { %s12_s12 = sadd.f32 0.01, %s11_s8 }
   0x5   :  { %14 = sst [smem:[#allocation3]] %s12_s12 }
   0x6   :  { %23 = dma.smem_to_hbm %s45_s13, 16, %s21_s11, [#allocation4]  }
   0x7   :  { %43 = dma.done.wait [#allocation4], 16  }
   0x8   :  { %44 = vsyncadd [#allocation4], 4294967280 }
   0x9   :  { %28 = sfence }
   0xa   :  { %29 = vsyncpa [#allocation4], 1 }

</bundles_post_ra>
